<compile_context>
chip_gen: v7x
topology: tpu7x:2x2x1
jax: 0.10.0
libtpu: 0.0.40
codegen_flags: <defaults>
</compile_context>

<pallas_src>
import functools

import jax
import jax.numpy as jnp
from jax import lax
from jax.experimental import pallas as pl
from jax.experimental.pallas import tpu as pltpu

_LANE = 128
_SUBLANE = 8


def _round_up(x, m):
    return (x + m - 1) // m * m


def _hash_keep_bits(idx, seed_u32):
    """Stateless per-element hash (murmur3-style finalizer) -> uniform uint32.

    idx: int32 array of non-negative flat weight-element indices.  The result
    depends only on (idx, seed), so the mask is invariant to how the weight is
    tiled across the grid (WeightDrop: one mask per forward pass).
    """
    x = idx.astype(jnp.uint32)
    x = (x + seed_u32) * jnp.uint32(0x9E3779B1)
    x = x ^ (x >> 16)
    x = x * jnp.uint32(0x85EBCA6B)
    x = x ^ (x >> 13)
    x = x * jnp.uint32(0xC2B2AE35)
    x = x ^ (x >> 16)
    return x


def _weight_drop_linear_kernel(seed_ref, x_ref, w_ref, b_ref, o_ref, acc_ref,
                               *, keep_prob, k_stride):
    """One (tm,tn) output tile, accumulated over the K grid axis.

    x_ref: (tm, tk)   w_ref: (tn, tk)  (native PyTorch [out, in] layout)
    b_ref: (1, tn)    o_ref/acc_ref: (tm, tn)
    """
    k = pl.program_id(2)

    @pl.when(k == 0)
    def _():
        acc_ref[...] = jnp.zeros_like(acc_ref)

    w = w_ref[...]
    if keep_prob < 1.0:
        tn, tk = w_ref.shape
        n0 = pl.program_id(1) * tn          # absolute output-feature offset
        k0 = k * tk                         # absolute input-feature offset
        rows = lax.broadcasted_iota(jnp.int32, (tn, tk), 0) + n0
        cols = lax.broadcasted_iota(jnp.int32, (tn, tk), 1) + k0
        idx = rows * k_stride + cols        # unique flat index per weight element
        thr = jnp.uint32(min(int(round(keep_prob * 2.0 ** 32)), 2 ** 32 - 1))
        keep = _hash_keep_bits(idx, seed_ref[0].astype(jnp.uint32)) < thr
        # Pure integer threshold + select; 1/keep_prob rescale is folded into
        # the (B*tn sized) output tile in the finalize branch below.
        w = jnp.where(keep, w, jnp.float32(0.0))

    acc_ref[...] += lax.dot_general(
        x_ref[...], w,
        dimension_numbers=(((1,), (1,)), ((), ())),   # contract on K (no transpose copy)
        preferred_element_type=jnp.float32)

    @pl.when(k == pl.num_programs(2) - 1)
    def _():
        res = acc_ref[...]
        if keep_prob < 1.0:
            res = res * jnp.float32(1.0 / keep_prob)
        o_ref[...] = (res + b_ref[...]).astype(o_ref.dtype)


def weight_drop_linear(x, w_raw, b, seed, *, dropout=0.5, training=True):
    """WeightDrop(nn.Linear(K, N), weights=['weight'], dropout).forward(x).

    x: [B, K] f32, w_raw: [N, K] f32 (PyTorch layout), b: [N] f32,
    seed: int — vary per training step, same seed -> same mask.
    """
    x = jnp.asarray(x, jnp.float32)
    w_raw = jnp.asarray(w_raw, jnp.float32)
    b = jnp.asarray(b, jnp.float32)

    B, K = x.shape
    N, K2 = w_raw.shape
    assert K == K2, (x.shape, w_raw.shape)

    keep_prob = 1.0 if (not training or dropout == 0.0) else 1.0 - float(dropout)
    if keep_prob <= 0.0:
        # F.dropout(p=1) zeroes the weight entirely -> output is just the bias.
        return jnp.broadcast_to(b[None, :], (B, N))

    # Pad to TPU-friendly (sublane, lane) multiples so output stores are
    # lane-dense and blocks satisfy the (8,128) rule; slice back at the end.
    Bp = _round_up(B, _SUBLANE)
    Np = _round_up(N, _LANE)
    Kp = _round_up(K, _LANE)

    tm = Bp if Bp <= 256 else 256
    Bp = _round_up(Bp, tm)
    tn = 256 if Np % 256 == 0 else 128
    tk = 256 if Kp % 256 == 0 else 128

    xp = x if (Bp, Kp) == (B, K) else jnp.pad(x, ((0, Bp - B), (0, Kp - K)))
    wp = w_raw if (Np, Kp) == (N, K) else jnp.pad(w_raw, ((0, Np - N), (0, Kp - K)))
    bp = b if Np == N else jnp.pad(b, (0, Np - N))
    b2 = bp.reshape(1, Np)

    seed_arr = jnp.asarray([seed], dtype=jnp.int32)
    grid = (Bp // tm, Np // tn, Kp // tk)

    kernel = functools.partial(_weight_drop_linear_kernel,
                               keep_prob=keep_prob, k_stride=Kp)

    out = pl.pallas_call(
        kernel,
        out_shape=jax.ShapeDtypeStruct((Bp, Np), jnp.float32),
        grid_spec=pltpu.PrefetchScalarGridSpec(
            num_scalar_prefetch=1,                      # seed lands in SMEM
            grid=grid,
            in_specs=[
                pl.BlockSpec((tm, tk), lambda m, n, k, seed: (m, k)),
                pl.BlockSpec((tn, tk), lambda m, n, k, seed: (n, k)),
                pl.BlockSpec((1, tn), lambda m, n, k, seed: (0, n)),
            ],
            out_specs=pl.BlockSpec((tm, tn), lambda m, n, k, seed: (m, n)),
            scratch_shapes=[pltpu.VMEM((tm, tn), jnp.float32)],
        ),
        compiler_params=pltpu.CompilerParams(
            dimension_semantics=("parallel", "parallel", "arbitrary"),
            vmem_limit_bytes=48 * 1024 * 1024,
        ),
    )(seed_arr, xp, wp, b2)

    if (Bp, Np) != (B, N):
        out = out[:B, :N]
    return out


def weight_drop_linear_ref(x, w_raw, b, seed, *, dropout=0.5, training=True):
    """Pure-JAX reference using the same deterministic hash mask as the kernel."""
    x = jnp.asarray(x, jnp.float32)
    w_raw = jnp.asarray(w_raw, jnp.float32)
    b = jnp.asarray(b, jnp.float32)
    N, K = w_raw.shape
    keep_prob = 1.0 if (not training or dropout == 0.0) else 1.0 - float(dropout)
    if keep_prob <= 0.0:
        return jnp.broadcast_to(b[None, :], (x.shape[0], N))
    w = w_raw
    if keep_prob < 1.0:
        Kp = _round_up(K, _LANE)
        rows = jnp.arange(N, dtype=jnp.int32)[:, None]
        cols = jnp.arange(K, dtype=jnp.int32)[None, :]
        idx = rows * Kp + cols
        thr = jnp.uint32(min(int(round(keep_prob * 2.0 ** 32)), 2 ** 32 - 1))
        keep = _hash_keep_bits(idx, jnp.uint32(seed)) < thr
        w = jnp.where(keep, w_raw, 0.0) / keep_prob
    return x @ w.T + b


# TODO(synk): variational=True (shared mask per output row, shape (N,1)) and
# wrapping nn.RNNBase weight_hh matrices are trivial variants of the same
# masked-matmul kernel; only the standard variational=False Linear path is wired up.


if __name__ == "__main__":
    key = jax.random.PRNGKey(0)
    kx, kw, kb, kx2, kw2, kb2 = jax.random.split(key, 6)

    # Lane/MXU-friendly shapes (128 multiples) exercising K accumulation
    # (grid k = 2) and N tiling (grid n = 3).
    B, K, N = 8, 512, 384
    dropout = 0.5
    seed = 1234

    x = jax.random.normal(kx, (B, K), dtype=jnp.float32)
    w_raw = jax.random.normal(kw, (N, K), dtype=jnp.float32) * (1.0 / jnp.sqrt(K))
    bias = jax.random.normal(kb, (N,), dtype=jnp.float32) * 0.01

    out = jax.block_until_ready(
        weight_drop_linear(x, w_raw, bias, seed, dropout=dropout, training=True))
    assert out.shape == (B, N)
    assert bool(jnp.all(jnp.isfinite(out)))

    ref = weight_drop_linear_ref(x, w_raw, bias, seed, dropout=dropout, training=True)
    assert bool(jnp.allclose(out, ref, atol=2e-2, rtol=2e-2)), \
        float(jnp.max(jnp.abs(out - ref)))

    # Same seed -> same mask -> identical output (deterministic across calls).
    out2 = jax.block_until_ready(
        weight_drop_linear(x, w_raw, bias, seed, dropout=dropout, training=True))
    assert bool(jnp.array_equal(out, out2))

    # dropout=0 (or eval mode) must match a plain linear.
    out_nodrop = jax.block_until_ready(
        weight_drop_linear(x, w_raw, bias, seed, dropout=0.0, training=True))
    ref_nodrop = x @ w_raw.T + bias
    assert bool(jnp.allclose(out_nodrop, ref_nodrop, atol=2e-2, rtol=2e-2))

    # Unaligned small shapes exercise the pad / slice path.
    B2s, K2s, N2s = 5, 40, 24
    x2 = jax.random.normal(kx2, (B2s, K2s), dtype=jnp.float32)
    w2 = jax.random.normal(kw2, (N2s, K2s), dtype=jnp.float32) * (1.0 / jnp.sqrt(K2s))
    b2 = jax.random.normal(kb2, (N2s,), dtype=jnp.float32) * 0.01
    out_small = jax.block_until_ready(
        weight_drop_linear(x2, w2, b2, seed=7, dropout=0.25, training=True))
    ref_small = weight_drop_linear_ref(x2, w2, b2, 7, dropout=0.25, training=True)
    assert out_small.shape == (B2s, N2s)
    assert bool(jnp.allclose(out_small, ref_small, atol=2e-2, rtol=2e-2))

    print("KERNEL_OK")
</pallas_src>

<mosaic_0001>
module attributes {stable_mosaic.version = 11 : i64} {
  func.func @_weight_drop_linear_kernel(%arg0: i32, %arg1: i32, %arg2: i32, %arg3: memref<1xi32, #tpu.memory_space<smem>>, %arg4: memref<8x256xf32, #tpu.memory_space<vmem>>, %arg5: memref<128x256xf32, #tpu.memory_space<vmem>>, %arg6: memref<1x128xf32, #tpu.memory_space<vmem>>, %arg7: memref<8x128xf32, #tpu.memory_space<vmem>>, %arg8: memref<8x128xf32, #tpu.memory_space<vmem>>) attributes {dimension_semantics = [#tpu.dimension_semantics<parallel>, #tpu.dimension_semantics<parallel>, #tpu.dimension_semantics<arbitrary>], iteration_bounds = array<i64: 1, 3, 2>, scalar_prefetch = 1 : i64, scratch_operands = 1 : i64, tpu.core_type = #tpu.core_type<tc>, window_params = [{transform_indices = @transform_0, window_bounds = array<i64: 8, 256>}, {transform_indices = @transform_1, window_bounds = array<i64: 128, 256>}, {transform_indices = @transform_2, window_bounds = array<i64: 1, 128>}, {transform_indices = @transform_3, window_bounds = array<i64: 8, 128>}]} {
    %c0_i32 = arith.constant 0 : i32
    %0 = arith.cmpi eq, %arg2, %c0_i32 : i32
    %1 = arith.extui %0 : i1 to i32
    %c0_i32_0 = arith.constant 0 : i32
    %2 = arith.cmpi ne, %1, %c0_i32_0 : i32
    scf.if %2 {
      %cst_12 = arith.constant 0.000000e+00 : f32
      %45 = vector.broadcast %cst_12 : f32 to vector<8x128xf32>
      %c0_13 = arith.constant 0 : index
      %c0_14 = arith.constant 0 : index
      %46 = vector.load %arg8[%c0_13, %c0_14] : memref<8x128xf32, #tpu.memory_space<vmem>>, vector<8x128xf32>
      tpu.vector_store %arg8[%c0_13, %c0_14], %45 {strides = array<i32>} : memref<8x128xf32, #tpu.memory_space<vmem>>, vector<8x128xf32>,
    } else {
    }
    %c0 = arith.constant 0 : index
    %c0_1 = arith.constant 0 : index
    %3 = vector.load %arg5[%c0, %c0_1] : memref<128x256xf32, #tpu.memory_space<vmem>>, vector<128x256xf32>
    %c128_i32 = arith.constant 128 : i32
    %4 = arith.muli %arg1, %c128_i32 : i32
    %c256_i32 = arith.constant 256 : i32
    %5 = arith.muli %arg2, %c256_i32 : i32
    %6 = tpu.iota {dimensions = array<i32: 0>} : vector<128x256xi32>
    %7 = vector.broadcast %4 : i32 to vector<128x256xi32>
    %8 = arith.addi %6, %7 : vector<128x256xi32>
    %9 = tpu.iota {dimensions = array<i32: 1>} : vector<128x256xi32>
    %10 = vector.broadcast %5 : i32 to vector<128x256xi32>
    %11 = arith.addi %9, %10 : vector<128x256xi32>
    %c512_i32 = arith.constant 512 : i32
    %12 = vector.broadcast %c512_i32 : i32 to vector<128x256xi32>
    %13 = arith.muli %8, %12 : vector<128x256xi32>
    %14 = arith.addi %13, %11 : vector<128x256xi32>
    %c0_2 = arith.constant 0 : index
    %15 = memref.load %arg3[%c0_2] : memref<1xi32, #tpu.memory_space<smem>>
    %16 = vector.broadcast %15 : i32 to vector<128x256xi32>
    %17 = arith.addi %14, %16 : vector<128x256xi32>
    %c-1640531535_i32 = arith.constant -1640531535 : i32
    %18 = vector.broadcast %c-1640531535_i32 : i32 to vector<128x256xi32>
    %19 = arith.muli %17, %18 : vector<128x256xi32>
    %c16_i32 = arith.constant 16 : i32
    %20 = vector.broadcast %c16_i32 : i32 to vector<128x256xi32>
    %21 = arith.shrui %19, %20 : vector<128x256xi32>
    %22 = arith.xori %19, %21 : vector<128x256xi32>
    %c-2048144789_i32 = arith.constant -2048144789 : i32
    %23 = vector.broadcast %c-2048144789_i32 : i32 to vector<128x256xi32>
    %24 = arith.muli %22, %23 : vector<128x256xi32>
    %c13_i32 = arith.constant 13 : i32
    %25 = vector.broadcast %c13_i32 : i32 to vector<128x256xi32>
    %26 = arith.shrui %24, %25 : vector<128x256xi32>
    %27 = arith.xori %24, %26 : vector<128x256xi32>
    %c-1028477387_i32 = arith.constant -1028477387 : i32
    %28 = vector.broadcast %c-1028477387_i32 : i32 to vector<128x256xi32>
    %29 = arith.muli %27, %28 : vector<128x256xi32>
    %c16_i32_3 = arith.constant 16 : i32
    %30 = vector.broadcast %c16_i32_3 : i32 to vector<128x256xi32>
    %31 = arith.shrui %29, %30 : vector<128x256xi32>
    %32 = arith.xori %29, %31 : vector<128x256xi32>
    %c-2147483648_i32 = arith.constant -2147483648 : i32
    %33 = vector.broadcast %c-2147483648_i32 : i32 to vector<128x256xi32>
    %34 = arith.cmpi ult, %32, %33 : vector<128x256xi32>
    %cst = arith.constant 0.000000e+00 : f32
    %35 = vector.broadcast %cst : f32 to vector<128x256xf32>
    %36 = arith.select %34, %3, %35 : vector<128x256xi1>, vector<128x256xf32>
    %c0_4 = arith.constant 0 : index
    %c0_5 = arith.constant 0 : index
    %37 = vector.load %arg8[%c0_4, %c0_5] : memref<8x128xf32, #tpu.memory_space<vmem>>, vector<8x128xf32>
    %c0_6 = arith.constant 0 : index
    %c0_7 = arith.constant 0 : index
    %38 = vector.load %arg4[%c0_6, %c0_7] : memref<8x256xf32, #tpu.memory_space<vmem>>, vector<8x256xf32>
    %cst_8 = arith.constant dense<0.000000e+00> : vector<8x128xf32>
    %39 = tpu.matmul %38, %36, %cst_8 {dimension_numbers = #tpu.dot_dimension_numbers<[1], [1], [0], [0], [0, 0, 1, 0], [], []>} : vector<8x256xf32>, vector<128x256xf32>, vector<8x128xf32> -> vector<8x128xf32>
    %40 = arith.addf %37, %39 : vector<8x128xf32>
    %c0_9 = arith.constant 0 : index
    %c0_10 = arith.constant 0 : index
    %41 = vector.load %arg8[%c0_9, %c0_10] : memref<8x128xf32, #tpu.memory_space<vmem>>, vector<8x128xf32>
    tpu.vector_store %arg8[%c0_9, %c0_10], %40 {strides = array<i32>} : memref<8x128xf32, #tpu.memory_space<vmem>>, vector<8x128xf32>,
    %c1_i32 = arith.constant 1 : i32
    %42 = arith.cmpi eq, %arg2, %c1_i32 : i32
    %43 = arith.extui %42 : i1 to i32
    %c0_i32_11 = arith.constant 0 : i32
    %44 = arith.cmpi ne, %43, %c0_i32_11 : i32
    scf.if %44 {
      %c0_12 = arith.constant 0 : index
      %c0_13 = arith.constant 0 : index
      %45 = vector.load %arg8[%c0_12, %c0_13] : memref<8x128xf32, #tpu.memory_space<vmem>>, vector<8x128xf32>
      %cst_14 = arith.constant 2.000000e+00 : f32
      %46 = vector.broadcast %cst_14 : f32 to vector<8x128xf32>
      %47 = arith.mulf %45, %46 : vector<8x128xf32>
      %c0_15 = arith.constant 0 : index
      %c0_16 = arith.constant 0 : index
      %48 = vector.load %arg6[%c0_15, %c0_16] : memref<1x128xf32, #tpu.memory_space<vmem>>, vector<1x128xf32>
      %49 = vector.broadcast %48 : vector<1x128xf32> to vector<8x128xf32>
      %50 = arith.addf %47, %49 : vector<8x128xf32>
      %c0_17 = arith.constant 0 : index
      %c0_18 = arith.constant 0 : index
      %51 = vector.load %arg7[%c0_17, %c0_18] : memref<8x128xf32, #tpu.memory_space<vmem>>, vector<8x128xf32>
      tpu.vector_store %arg7[%c0_17, %c0_18], %50 {strides = array<i32>} : memref<8x128xf32, #tpu.memory_space<vmem>>, vector<8x128xf32>,
    } else {
    }
    return
  }
  func.func @transform_0(%arg0: i32, %arg1: i32, %arg2: i32, %arg3: memref<1xi32, #tpu.memory_space<smem>>) -> (i32, i32) {
    %c0_i32 = arith.constant 0 : i32
    return %arg0, %arg2 : i32, i32
  }
  func.func @transform_1(%arg0: i32, %arg1: i32, %arg2: i32, %arg3: memref<1xi32, #tpu.memory_space<smem>>) -> (i32, i32) {
    %c0_i32 = arith.constant 0 : i32
    return %arg1, %arg2 : i32, i32
  }
  func.func @transform_2(%arg0: i32, %arg1: i32, %arg2: i32, %arg3: memref<1xi32, #tpu.memory_space<smem>>) -> (i32, i32) {
    %c0_i32 = arith.constant 0 : i32
    %c0_i32_0 = arith.constant 0 : i32
    return %c0_i32, %arg1 : i32, i32
  }
  func.func @transform_3(%arg0: i32, %arg1: i32, %arg2: i32, %arg3: memref<1xi32, #tpu.memory_space<smem>>) -> (i32, i32) {
    %c0_i32 = arith.constant 0 : i32
    return %arg0, %arg1 : i32, i32
  }
}

</mosaic_0001>

<bundles_post_ra>
// kernel: tpu_custom_call.1
= control target key start
LH: loop header
LB: loop body
LE: loop exit
PB: predicated region body
PF: predicated region fallthrough
CT: control target
= control target key end

     0   :  { %s2142_s0 = inlined_call_operand.<no memory space> [shape: s32[1], index: 0, kind: input, shape index: {}]   ;;  %s2143_s1 = inlined_call_operand.hbm [shape: f32[8,512], index: 1, kind: input, shape index: {}]   ;;  %s2144_s2 = inlined_call_operand.hbm [shape: f32[384,512], index: 2, kind: input, shape index: {}]   ;;  %s2145_s3 = inlined_call_operand.vmem [shape: f32[1,384], index: 3, kind: input, shape index: {}]   ;;  %s2146_s4 = inlined_call_operand.hbm [shape: f32[8,384], index: 4, kind: output, shape index: {}]  }
   0x1   :  { %2155 = sst [smem:[#allocation22_spill]] %s2143_s1 }
   0x2   :  { %9 = sst [smem:[#allocation4]] %s2142_s0 }
   0x3   :  { %10 = vsyncpa [#allocation6], 0 }
   0x4   :  { %12 = vsyncpa [#allocation6 + $0x1], 0 }
   0x5   :  { %13 = vsyncpa [#allocation9], 0 }
   0x6   :  { %15 = vsyncpa [#allocation9 + $0x1], 0 }
   0x7   :  { %16 = vsyncpa [#allocation7], 0 }
   0x8   :  { %18 = vsyncpa [#allocation7 + $0x1], 0  ;;  %s1508_s17 = smov 0   ;;  %s1510_s18 = smov 0  }
   0x9   :  { %s1512_s19 = smov 0   ;;  %s1514_s20 = smov 0  }
   0xa   :  { %s1516_s21 = smov 0   ;;  %s1518_s22 = smov 0  }
   0xb   :  { %s1520_s23 = smov 0   ;;  %s1522_s0 = smov 0  }
   0xc   :  { %s1524_s24 = smov 0   ;;  %s1526_s25 = smov 0  }
   0xd   :  { %s1528_s26 = smov 0   ;;  %s1530_s27 = smov 0  }
   0xe   :  { %s1532_s28 = smov 0   ;;  %s1534_s29 = smov 0  }
   0xf LB: > { %2156 = sst [smem:[#allocation14_spill]] %s1427_s19  ;;  %s1019_s30 = sadd.s32 4294967295, %s1471_s29   ;;  %s1471_s29 = sphi %s1534_s29, %s24_s29   ;;  %s1467_s28 = sphi %s1532_s28, %s2190_s28   ;;  %s1463_s27 = sphi %s1530_s27, %s2199_s27   ;;  %s1459_s26 = sphi %s1528_s26, %s2188_s26   ;;  %s1455_s25 = sphi %s1526_s25, %s2198_s25   ;;  %s1451_s24 = sphi %s1524_s24, %s2187_s24   ;;  %s1447_s0 = sphi %s1522_s0, %s2197_s0   ;;  %s1443_s23 = sphi %s1520_s23, %s2196_s23   ;;  %s1439_s22 = sphi %s1518_s22, %s2195_s22   ;;  %s1435_s21 = sphi %s1516_s21, %s2194_s21   ;;  %s1431_s20 = sphi %s1514_s20, %s2193_s20   ;;  %s1427_s19 = sphi %s1512_s19, %s2184_s19   ;;  %s1423_s18 = sphi %s1510_s18, %s2192_s18   ;;  %s1419_s17 = sphi %s1508_s17, %s2191_s17  }
  0x10   : > { %2157 = sst [smem:[#allocation15_spill]] %s1451_s24  ;;  %s36_s6 = sadd.s32 1, %s1463_s27 }
  0x11   : > { %2158 = sst [smem:[#allocation16_spill]] %s1467_s28  ;;  %s39_s7 = sadd.s32 1, %s1467_s28 }
  0x12   : > { %p37_p0 = scmp.ge.s32.totalorder %s36_s6, 2  ;;  %s52_s8 = sadd.s32 1, %s1451_s24 }
  0x13   : > { %p59_p1 = scmp.ne.s32.totalorder %s1451_s24, %s1447_s0  ;;  %p60_p2 = scmp.eq.s32.totalorder %s1471_s29, 0 }
  0x14   : > { %s2201_s6 = smov (%p37_p0, %s36_s6), 0  ;;  %s2203_s7 = smov (!%p37_p0, %s39_s7), %s1467_s28 }
  0x15   : > { %2159 = sst [smem:[#allocation17_spill]] %s2201_s6  ;;  %s48_s9 = ssub.s32 %s1463_s27, %s2201_s6 }
  0x16   : > { %p1591_p3 = por %p60_p2, %p59_p1  ;;  %p41_p4 = scmp.ge.s32.totalorder %s2203_s7, 3 }
  0x17   : > { %p50_p5 = scmp.eq.s32.totalorder %s48_s9, 0  ;;  %p65_p6 = scmp.ne.s32.totalorder %s1447_s0, %s1443_s23 }
  0x18   : > { %p1598_p7 = scmp.eq.s32.totalorder %s1019_s30, 0  ;;  %s2205_s7 = smov (%p41_p4, %s2203_s7), 0 }
  0x19   : > { %2162 = sst [smem:[#allocation18_spill]] %s2205_s7  ;;  %s75_s14 = ssub.s32 %s1467_s28, %s2205_s7 }
  0x1a   : > { %s1605_s12 = scalar_select %p50_p5, %s1451_s24, %s52_s8  }
  0x1b   : > { %p1609_p8 = por %p1598_p7, %p65_p6  ;;  %s77_s15 = sor.u32 %s75_s14, %s48_s9 }
  0x1c   : > { %2163 = sst [smem:[#allocation19_spill]] %s1605_s12  ;;  %s80_s16 = sadd.s32 1, %s1439_s22 }
  0x1d   : > { %s2164_s13 = scalar_select %p1609_p8, 1, 0 }
  0x1e   : > { %p78_p9 = scmp.eq.s32.totalorder %s77_s15, 0  ;;  %p87_p10 = scmp.ne.s32.totalorder %s1439_s22, %s1435_s21 }
  0x1f   : > { %p93_p11 = scmp.ne.s32.totalorder %s1435_s21, %s1431_s20  ;;  %p132_p12 = scmp.eq.s32.totalorder %s75_s14, 0 }
  0x20   : > { %s1621_s23 = scalar_select %p78_p9, %s1439_s22, %s80_s16  }
  0x21   : > { %p1625_p13 = por %p87_p10, %p60_p2  ;;  %p1631_p0 = por %p93_p11, %p1598_p7 }
  0x22   : > { %2165 = sst [smem:[#allocation20_spill]] %s1621_s23  ;;  %s134_s9 = sadd.s32 1, %s1427_s19 }
  0x23   : > { %s2167_s5 = scalar_select %p1631_p0, 1, 0 }
  0x24   : > { %p144_p1 = scmp.ne.s32.totalorder %s1427_s19, %s1423_s18  ;;  %p145_p4 = scmp.eq.s32.totalorder %s1019_s30, 5 }
  0x25   : > { %s1639_s15 = scalar_select %p132_p12, %s1427_s19, %s134_s9  }
  0x26   : > { %p150_p5 = scmp.ne.s32.totalorder %s1423_s18, %s1419_s17  ;;  %s2169_s20 = sadd.s32 4294967294, %s1471_s29  }
  0x27   : > { %2168 = sst [smem:[#allocation21_spill]] %s1639_s15  ;;  %p151_p2 = scmp.eq.s32.totalorder %s2169_s20, 5 }
  0x28   : > { %p1647_p6 = por %p145_p4, %p144_p1  ;;  %p1143_p7 = scmp.lt.s32.totalorder %s1471_s29, 6 }
  0x29   : > { %p1652_p9 = por %p151_p2, %p150_p5  ;;  %s171_s16 = sand.u32 1, %s1451_s24  }
  0x2a   : > { %s2170_s14 = scalar_select %p1647_p6, 1, 0 }
  0x2b   : > { %s2171_s11 = scalar_select %p1652_p9, 1, 0 }
  0x2c   : > { %s1023_s7 = sshll.u32 %s171_s16, 4  ;;  %s1076_s9 = sshll.u32 %s1463_s27, 8 }
  0x2d   : > { %s2172_s1 = sld [smem:[#allocation22_spill]]  ;;  %s175_s20 = scalar_lea.vmem [#allocation5], %s1023_s7 }
  0x2e   : > { %s185_s23 = sshll.u32 %s175_s20, 4  ;;  %p1667_p10 = pnand %p1143_p7, %p1591_p3  ;;  %s1663_s23 = int_to_ptr.vmem [resolvable:$true] %s185_s23 }
  0x2f   : > { %p1674_p11 = pnand %p1143_p7, %p1625_p13  ;;  %s172_s12 = scalar_lea.sflag [#allocation6], %s171_s16 }
  0x30   : > { %p1263_p4 = pneg %p1667_p10 }
  0x33   : > { %s1661_s30 = scalar_lea.hbm %s2172_s1, %s1076_s9  ;;  %s1266_s20 = scalar_lea.hbm %s2172_s1, 512 }
  0x34   : > { %s1261_s7 = scalar_lea.hbm %s1661_s30, 256  ;;  %p1267_p13 = scmp.lt.u32.totalorder %s1661_s30, %s2172_s1 }
  0x35   : > { %p1262_p1 = scmp.ne.s32.totalorder %s1661_s30, %s1261_s7  ;;  %p1268_p2 = scmp.lt.u32.totalorder %s1266_s20, %s1261_s7 }
  0x36   : > { %p1270_p12 = scmp.lt.u32.totalorder %s1261_s7, %s1661_s30 }
  0x37   : > { %p1264_p3 = pnand %p1263_p4, %p1262_p1  ;;  %p1269_p7 = por %p1268_p2, %p1267_p13 }
  0x39   : > { %p1265_p5 = pneg %p1264_p3  ;;  %p1271_p9 = por %p1270_p12, %p1269_p7 }
  0x3b   : > { %p1272_p6 = pnand %p1271_p9, %p1265_p5 }
  0x3d   : > { %1275 = shalt.err (!%p1272_p6)
}
  0x3e   : > { %s1276_s16 = scalar_lea.vmem %s1663_s23, 256  ;;  %s1473_s10 = smov [#allocation5]  }
  0x3f   : > { %p1277_p1 = scmp.ne.s32.totalorder %s1663_s23, %s1276_s16  ;;  %s1281_s9 = sshll.u32 %s1473_s10, 4  ;;  %s1282_s9 = int_to_ptr.vmem [resolvable:$false] %s1281_s9 }
  0x40   : > { %s1283_s24 = scalar_lea.vmem %s1282_s9, 512  ;;  %p1284_p8 = scmp.lt.s32.totalorder %s1663_s23, %s1282_s9 }
  0x41   : > { %p1279_p3 = pnand %p1277_p1, %p1263_p4  ;;  %p1285_p13 = scmp.lt.s32.totalorder %s1283_s24, %s1276_s16 }
  0x43   : > { %p1280_p0 = pneg %p1279_p3  ;;  %p1286_p2 = por %p1285_p13, %p1284_p8 }
  0x45   : > { %p1287_p12 = pnand %p1286_p2, %p1280_p0 }
  0x47   : > { %1290 = shalt.err (!%p1287_p12)
}
  0x48   : > { %1135 = dma.hbm_to_vmem [thread:$0]  (!%p1667_p10), %s1661_s30, 256, %s1663_s23, %s172_s12  }
  0x49   : > { %p220_p6 = scmp.lt.s32.totalorder %s1471_s29, 7  ;;  %s192_s7 = sand.u32 1, %s1439_s22  }
  0x4a   : > { %s1077_s20 = sshll.u32 %s1467_s28, 6  ;;  %p2175_p9 = scmp.ge.s32.totalorder %s1471_s29, 1 }
  0x4b   : > { %s1026_s16 = sshll.u32 %s192_s7, 8  ;;  %s2177_s15 = sshll.u32 %s1463_s27, 1 }
  0x4c   : > { %p1709_p4 = pnand %p2175_p9, %p220_p6  ;;  %s203_s10 = sadd.s32 %s1077_s20, %s2177_s15 }
  0x4d   : > { %s1030_s9 = sshll.u32 %s203_s10, 7  ;;  %s196_s23 = scalar_lea.vmem [#allocation8], %s1026_s16 }
  0x4e   : > { %s1718_s19 = scalar_lea.hbm %s2144_s2, %s1030_s9  ;;  %s206_s30 = sshll.u32 %s196_s23, 4  ;;  %s1720_s30 = int_to_ptr.vmem [resolvable:$true] %s206_s30 }
  0x4f   : > { %s1722_s12 = scalar_lea.sflag [#allocation9], %s192_s7  ;;  %s1291_s28 = scalar_lea.hbm %s1718_s19, 4096 }
  0x50   : > { %p1292_p8 = scmp.ne.s32.totalorder %s1718_s19, %s1291_s28  ;;  %p1293_p0 = pneg %p1674_p11 }
  0x51   : > { %s1296_s15 = scalar_lea.hbm %s2144_s2, 24576  ;;  %p1297_p7 = scmp.lt.u32.totalorder %s1718_s19, %s2144_s2 }
  0x52   : > { %p1294_p10 = pnand %p1293_p0, %p1292_p8  ;;  %p1298_p1 = scmp.lt.u32.totalorder %s1296_s15, %s1291_s28 }
  0x53   : > { %p1300_p13 = scmp.lt.u32.totalorder %s1291_s28, %s1718_s19 }
  0x54   : > { %p1295_p5 = pneg %p1294_p10  ;;  %p1299_p3 = por %p1298_p1, %p1297_p7 }
  0x56   : > { %p1301_p2 = por %p1300_p13, %p1299_p3 }
  0x58   : > { %p1302_p12 = pnand %p1301_p2, %p1295_p5 }
  0x5a   : > { %1305 = shalt.err (!%p1302_p12)
}
  0x5b   : > { %s1306_s7 = scalar_lea.vmem %s1720_s30, 4096  ;;  %s1474_s16 = smov [#allocation8]  }
  0x5c   : > { %p1307_p6 = scmp.ne.s32.totalorder %s1720_s30, %s1306_s7  ;;  %s1311_s24 = sshll.u32 %s1474_s16, 4  ;;  %s1312_s24 = int_to_ptr.vmem [resolvable:$false] %s1311_s24 }
  0x5d   : > { %s1313_s23 = scalar_lea.vmem %s1312_s24, 8192  ;;  %p1314_p10 = scmp.lt.s32.totalorder %s1720_s30, %s1312_s24 }
  0x5e   : > { %p1309_p9 = pnand %p1307_p6, %p1293_p0  ;;  %p1315_p7 = scmp.lt.s32.totalorder %s1313_s23, %s1306_s7 }
  0x60   : > { %p1310_p8 = pneg %p1309_p9  ;;  %p1316_p1 = por %p1315_p7, %p1314_p10 }
  0x62   : > { %p1317_p3 = pnand %p1316_p1, %p1310_p8 }
  0x64   : > { %1320 = shalt.err (!%p1317_p3)
}
  0x65   : > { %s1475_s28 = smov 512   ;;  %s1476_s1 = smov 256  }
  0x66   : > { %s1477_s20 = smov 16   ;;  %224 = sbr.rel (%p1709_p4) target bundleno = 505 (0x1f9), region = 32 }
  0x67   : > { %1138 = dma.hbm_to_vmem [thread:$0]  (!%p1674_p11), %s1718_s19, 4096, %s1720_s30, %s1722_s12, %s1475_s28, %s1476_s1, %s1477_s20  }
  0x68   : > { %s226_s15 = sand.u32 (!%p1709_p4), 1, %s1447_s0   ;;  %p2178_p0 = scmp.ne.s32.totalorder (!%p1709_p4), %s2164_s13, 0 }
  0x69   : > { %s1753_s10 = sshll.u32 (!%p1709_p4), %s226_s15, 4  ;;  %s227_s9 = scalar_lea.sflag (!%p1709_p4), [#allocation6], %s226_s15 }
  0x6a   : > { %s230_s7 = scalar_lea.vmem (!%p1709_p4), [#allocation5], %s1753_s10 }
  0x6d   : > { %1406 = dma.done.wait (%p2178_p0), %s227_s9, 256  }
  0x6e   : > { %1408 = vsyncadd (%p2178_p0), %s227_s9, 4294967040  ;;  %s235_s6 = sand.u32 1, %s1435_s21   ;;  %p2179_p11 = scmp.ne.s32.totalorder %s2167_s5, 0 }
  0x6f   : > { %s1033_s19 = sshll.u32 %s235_s6, 8  ;;  %s236_s30 = scalar_lea.sflag [#allocation9], %s235_s6 }
  0x70   : > { %s1761_s8 = scalar_lea.vmem [#allocation8], %s1033_s19 }
  0x71   : > { %1410 = dma.done.wait (%p2179_p11), %s236_s30, 4096  }
  0x72   : > { %1412 = vsyncadd (%p2179_p11), %s236_s30, 4294963200  ;;  %s267_s12 = sand.u32 1, %s1423_s18   ;;  %p273_p4 = scmp.lt.s32.totalorder %s1459_s26, 2 }
  0x73   : > { %s1771_s13 = sshll.u32 %s267_s12, 3  ;;  %p1035_p5 = scmp.ne.s32.totalorder %s1455_s25, 0 }
  0x74   : > { %s1774_s16 = scalar_select %p273_p4, %s1459_s26, 2 }
  0x75   : > { %s269_s1 = scalar_lea.vmem [#allocation10], %s1771_s13  ;;  %279 = sbr.rel (%p1035_p5) target bundleno = 124 (0x7c), region = 44  ;;  %v1478_v0 = vmov (!%p1035_p5), 0.0  }
  0x76   : > { %s275_s28 = scalar_lea.vmem %s2145_s3, %s1774_s16  ;;  %280 = vst [vmem:[#allocation2] sm:$0xff] (!%p1035_p5), %v1478_v0 }
  0x7c PF: > { %v1783_v1 = vld [vmem:[%s1761_s8 + $0x8] sm:$0xff]  ;;  %v1786_v2 = vld [vmem:[%s1761_s8 + $0x18] sm:$0xff]  ;;  %s1036_s5 = sshll.u32 %s1459_s26, 7  ;;  %s1037_s20 = sshll.u32 %s1455_s25, 8  ;;  %v315_v3 = vlaneseq  ;;  %v1791_v4 = vld [vmem:[%s1761_s8] sm:$0xff] }
  0x7d   : > { %v1795_v5 = vstv %s1036_s5  ;;  %v352_v6 = vstv %s1037_s20  ;;  %s403_s15 = sld [smem:[#allocation4]]  ;;  %v1798_v7 = vld [vmem:[%s1761_s8 + $0x10] sm:$0xff]  ;;  %v1078_v10 = vpack.c.bf16 %v1786_v2, %v1783_v1  ;;  %v1807_v12 = vld [vmem:[%s1761_s8 + $0x28] sm:$0xff]  ;;  %p1070_p13 = scmp.ne.s32.totalorder %s1455_s25, 1 }
  0x7e   : > { %v1800_v8 = vshrl.u32 %v315_v3, 7  ;;  %v350_v9 = vand.u32 127, %v315_v3  ;;  %v1081_v11 = vpack.c.bf16 %v1798_v7, %v1791_v4  ;;  %v1810_v13 = vld [vmem:[%s1761_s8 + $0x38] sm:$0xff]  ;;  %v1818_v18 = vld [vmem:[%s1761_s8 + $0x20] sm:$0xff]  ;;  %v1821_v19 = vld [vmem:[%s1761_s8 + $0x30] sm:$0xff] }
  0x7f   : > { %v1084_v27 = vpack.c.bf16 %v1810_v13, %v1807_v12  ;;  %v1087_v31 = vpack.c.bf16 %v1821_v19, %v1818_v18  ;;  %v791_v48 = vld [vmem:[%s230_s7 + $0x8] sm:$0xff]  ;;  %v1891_v2 = vld [vmem:[%s1761_s8 + $0x40] sm:$0xff] }
  0x80   : > { %v317_v14 = vadd.s32 8, %v1800_v8  ;;  %v333_v15 = vadd.s32 %v1795_v5, %v1800_v8  ;;  %v351_v16 = vadd.s32 128, %v350_v9  ;;  %v1815_v17 = vadd.s32 %v352_v6, %v350_v9  ;;  %856 = vmatprep.mubr.f32.mxu0 %v791_v48 }
  0x81   : > { %v318_v20 = vadd.s32 16, %v1800_v8  ;;  %v319_v21 = vadd.s32 24, %v1800_v8  ;;  %v320_v22 = vadd.s32 32, %v1800_v8  ;;  %v321_v23 = vadd.s32 40, %v1800_v8 }
  0x82   : > { %v334_v24 = vadd.s32 %v1795_v5, %v317_v14  ;;  %v1828_v25 = vadd.s32 %v352_v6, %v351_v16  ;;  %v355_v26 = vmul.u32 512, %v333_v15  ;;  %v322_v39 = vadd.s32 48, %v1800_v8 }
  0x83   : > { %v1832_v28 = vstv %s403_s15  ;;  %v335_v29 = vadd.s32 %v1795_v5, %v318_v20  ;;  %v336_v30 = vadd.s32 %v1795_v5, %v319_v21  ;;  %v1841_v35 = vadd.s32 %v1795_v5, %v320_v22 }
  0x84   : > { %v356_v32 = vmul.u32 512, %v334_v24  ;;  %v372_v33 = vadd.s32 %v355_v26, %v1828_v25  ;;  %v371_v34 = vadd.s32 %v355_v26, %v1815_v17  ;;  %v1844_v38 = vadd.s32 %v1795_v5, %v321_v23 }
  0x85   : > { %v357_v36 = vmul.u32 512, %v335_v29  ;;  %v358_v37 = vmul.u32 512, %v336_v30  ;;  %v1864_v63 = vadd.s32 56, %v1800_v8  ;;  %v1867_v0 = vadd.s32 %v1795_v5, %v322_v39 }
  0x86   : > { %v374_v40 = vadd.s32 %v356_v32, %v1828_v25  ;;  %v406_v41 = vadd.s32 %v1832_v28, %v372_v33  ;;  %v373_v42 = vadd.s32 %v356_v32, %v1815_v17  ;;  %v405_v43 = vadd.s32 %v1832_v28, %v371_v34 }
  0x87   : > { %v376_v44 = vadd.s32 %v357_v36, %v1828_v25  ;;  %v378_v45 = vadd.s32 %v358_v37, %v1828_v25  ;;  %v375_v46 = vadd.s32 %v357_v36, %v1815_v17  ;;  %v377_v47 = vadd.s32 %v358_v37, %v1815_v17 }
  0x88   : > { %v408_v49 = vadd.s32 %v1832_v28, %v374_v40  ;;  %v438_v50 = vmul.u32 2654435761, %v406_v41  ;;  %v407_v51 = vadd.s32 %v1832_v28, %v373_v42  ;;  %v437_v52 = vmul.u32 2654435761, %v405_v43 }
  0x89   : > { %v410_v53 = vadd.s32 %v1832_v28, %v376_v44  ;;  %v412_v54 = vadd.s32 %v1832_v28, %v378_v45  ;;  %v409_v55 = vadd.s32 %v1832_v28, %v375_v46  ;;  %v411_v56 = vadd.s32 %v1832_v28, %v377_v47 }
  0x8a   : > { %v440_v57 = vmul.u32 2654435761, %v408_v49  ;;  %v470_v58 = vshrl.u32 %v438_v50, 16  ;;  %v439_v59 = vmul.u32 2654435761, %v407_v51  ;;  %v469_v60 = vshrl.u32 %v437_v52, 16 }
  0x8b   : > { %v442_v61 = vmul.u32 2654435761, %v410_v53  ;;  %v444_v62 = vmul.u32 2654435761, %v412_v54  ;;  %v1911_v13 = vadd.s32 64, %v1800_v8 }
  0x8c   : > { %v472_v3 = vshrl.u32 %v440_v57, 16  ;;  %v502_v6 = vxor.u32 %v470_v58, %v438_v50  ;;  %v471_v9 = vshrl.u32 %v439_v59, 16  ;;  %v501_v14 = vxor.u32 %v469_v60, %v437_v52 }
  0x8d   : > { %v474_v15 = vshrl.u32 %v442_v61, 16  ;;  %v476_v16 = vshrl.u32 %v444_v62, 16  ;;  %v441_v20 = vmul.u32 2654435761, %v409_v55  ;;  %v443_v21 = vmul.u32 2654435761, %v411_v56 }
  0x8e   : > { %v504_v22 = vxor.u32 %v472_v3, %v440_v57  ;;  %v534_v23 = vmul.u32 2246822507, %v502_v6  ;;  %v503_v24 = vxor.u32 %v471_v9, %v439_v59  ;;  %v533_v26 = vmul.u32 2246822507, %v501_v14 }
  0x8f   : > { %v506_v29 = vxor.u32 %v474_v15, %v442_v61  ;;  %v508_v30 = vxor.u32 %v476_v16, %v444_v62  ;;  %v473_v32 = vshrl.u32 %v441_v20, 16  ;;  %v475_v33 = vshrl.u32 %v443_v21, 16 }
  0x90   : > { %v536_v34 = vmul.u32 2246822507, %v504_v22  ;;  %v566_v36 = vshrl.u32 %v534_v23, 13  ;;  %v535_v37 = vmul.u32 2246822507, %v503_v24  ;;  %v565_v39 = vshrl.u32 %v533_v26, 13 }
  0x91   : > { %v538_v40 = vmul.u32 2246822507, %v506_v29  ;;  %v540_v41 = vmul.u32 2246822507, %v508_v30  ;;  %v505_v42 = vxor.u32 %v473_v32, %v441_v20  ;;  %v507_v43 = vxor.u32 %v475_v33, %v443_v21 }
  0x92   : > { %v568_v44 = vshrl.u32 %v536_v34, 13  ;;  %v598_v45 = vxor.u32 %v566_v36, %v534_v23  ;;  %v567_v46 = vshrl.u32 %v535_v37, 13  ;;  %v597_v47 = vxor.u32 %v565_v39, %v533_v26  ;;  %v1870_v39 = vld [vmem:[%s1761_s8 + $0x48] sm:$0xff] }
  0x93   : > { %v570_v48 = vshrl.u32 %v538_v40, 13  ;;  %v572_v49 = vshrl.u32 %v540_v41, 13  ;;  %v537_v50 = vmul.u32 2246822507, %v505_v42  ;;  %v539_v51 = vmul.u32 2246822507, %v507_v43 }
  0x94   : > { %v600_v52 = vxor.u32 %v568_v44, %v536_v34  ;;  %v630_v53 = vmul.u32 3266489909, %v598_v45  ;;  %v599_v54 = vxor.u32 %v567_v46, %v535_v37  ;;  %v629_v55 = vmul.u32 3266489909, %v597_v47 }
  0x95   : > { %v602_v56 = vxor.u32 %v570_v48, %v538_v40  ;;  %v604_v57 = vxor.u32 %v572_v49, %v540_v41  ;;  %v569_v58 = vshrl.u32 %v537_v50, 13  ;;  %v571_v59 = vshrl.u32 %v539_v51, 13  ;;  %v1873_v40 = vld [vmem:[%s1761_s8 + $0x58] sm:$0xff] }
  0x96   : > { %v632_v60 = vmul.u32 3266489909, %v600_v52  ;;  %v662_v61 = vshrl.u32 %v630_v53, 16  ;;  %v631_v62 = vmul.u32 3266489909, %v599_v54  ;;  %v661_v3 = vshrl.u32 %v629_v55, 16 }
  0x97   : > { %v634_v6 = vmul.u32 3266489909, %v602_v56  ;;  %v636_v9 = vmul.u32 3266489909, %v604_v57  ;;  %v601_v14 = vxor.u32 %v569_v58, %v537_v50  ;;  %v603_v15 = vxor.u32 %v571_v59, %v539_v51 }
  0x98   : > { %v664_v16 = vshrl.u32 %v632_v60, 16  ;;  %v694_v20 = vxor.u32 %v662_v61, %v630_v53  ;;  %v663_v21 = vshrl.u32 %v631_v62, 16  ;;  %v693_v22 = vxor.u32 %v661_v3, %v629_v55 }
  0x99   : > { %v666_v23 = vshrl.u32 %v634_v6, 16  ;;  %v668_v24 = vshrl.u32 %v636_v9, 16  ;;  %v633_v26 = vmul.u32 3266489909, %v601_v14  ;;  %v635_v29 = vmul.u32 3266489909, %v603_v15 }
  0x9a   : > { %v696_v30 = vxor.u32 %v664_v16, %v632_v60  ;;  %vm726_vm0 = vcmp.lt.u32.totalorder %v694_v20, 2147483648  ;;  %v695_v32 = vxor.u32 %v663_v21, %v631_v62  ;;  %vm725_vm1 = vcmp.lt.u32.totalorder %v693_v22, 2147483648 }
  0x9b   : > { %v698_v33 = vxor.u32 %v666_v23, %v634_v6  ;;  %v700_v34 = vxor.u32 %v668_v24, %v636_v9  ;;  %v665_v36 = vshrl.u32 %v633_v26, 16  ;;  %v667_v37 = vshrl.u32 %v635_v29, 16 }
  0x9c   : > { %vm728_vm2 = vcmp.lt.u32.totalorder %v696_v30, 2147483648  ;;  %vm727_vm3 = vcmp.lt.u32.totalorder %v695_v32, 2147483648  ;;  %v359_v41 = vmul.u32 512, %v1841_v35  ;;  %v360_v42 = vmul.u32 512, %v1844_v38 }
  0x9d   : > { %vm1079_vm4 = vmpackc.low %vm728_vm2, %vm726_vm0  ;;  %vm730_vm5 = vcmp.lt.u32.totalorder %v698_v33, 2147483648  ;;  %vm732_vm6 = vcmp.lt.u32.totalorder %v700_v34, 2147483648  ;;  %v697_v43 = vxor.u32 %v665_v36, %v633_v26  ;;  %v699_v44 = vxor.u32 %v667_v37, %v635_v29 }
  0x9e   : > { %1080 = vmatprep.subr.msk.bf16.mxu0 %vm1079_vm4, %v1078_v10  ;;  %vm1082_vm7 = vmpackc.low %vm727_vm3, %vm725_vm1  ;;  %v380_v45 = vadd.s32 %v359_v41, %v1828_v25  ;;  %v382_v46 = vadd.s32 %v360_v42, %v1828_v25  ;;  %v379_v35 = vadd.s32 %v359_v41, %v1815_v17  ;;  %v381_v38 = vadd.s32 %v360_v42, %v1815_v17  ;;  %v1894_v10 = vld [vmem:[%s1761_s8 + $0x50] sm:$0xff] }
  0x9f   : > { %1083 = vmatpush1.bf16.xpose.msk.msra.mxu0 %vm1082_vm7, %v1081_v11  ;;  %vm1085_vm8 = vmpackc.low %vm732_vm6, %vm730_vm5  ;;  %vm729_vm9 = vcmp.lt.u32.totalorder %v697_v43, 2147483648  ;;  %v1090_v1 = vpack.c.bf16 %v1873_v40, %v1870_v39  ;;  %v340_v47 = vadd.s32 %v1795_v5, %v1864_v63  ;;  %v361_v48 = vmul.u32 512, %v1867_v0 }
  0xa0   : > { %1086 = vmatprep.subr.msk.bf16.mxu0 %vm1085_vm8, %v1084_v27  ;;  %v414_v4 = vadd.s32 %v1832_v28, %v380_v45  ;;  %v416_v7 = vadd.s32 %v1832_v28, %v382_v46  ;;  %v413_v11 = vadd.s32 %v1832_v28, %v379_v35  ;;  %v415_v49 = vadd.s32 %v1832_v28, %v381_v38 }
  0xa1   : > { %vm731_vm10 = vcmp.lt.u32.totalorder %v699_v44, 2147483648  ;;  %v362_v50 = vmul.u32 512, %v340_v47  ;;  %v384_v51 = vadd.s32 %v361_v48, %v1828_v25  ;;  %v383_v63 = vadd.s32 %v361_v48, %v1815_v17 }
  0xa2   : > { %v446_v52 = vmul.u32 2654435761, %v414_v4  ;;  %v448_v0 = vmul.u32 2654435761, %v416_v7  ;;  %v1093_v12 = vpack.c.bf16 %v1894_v10, %v1891_v2  ;;  %vm1088_vm11 = vmpackc.low %vm731_vm10, %vm729_vm9  ;;  %v1924_v29 = vadd.s32 72, %v1800_v8 }
  0xa3   : > { %v445_v27 = vmul.u32 2654435761, %v413_v11  ;;  %v447_v53 = vmul.u32 2654435761, %v415_v49  ;;  %v386_v54 = vadd.s32 %v362_v50, %v1828_v25  ;;  %v418_v55 = vadd.s32 %v1832_v28, %v384_v51 }
  0xa4   : > { %v478_v56 = vshrl.u32 %v446_v52, 16  ;;  %v480_v57 = vshrl.u32 %v448_v0, 16  ;;  %v385_v58 = vadd.s32 %v362_v50, %v1815_v17  ;;  %v417_v59 = vadd.s32 %v1832_v28, %v383_v63 }
  0xa5   : > { %v477_v60 = vshrl.u32 %v445_v27, 16  ;;  %v479_v61 = vshrl.u32 %v447_v53, 16  ;;  %v420_v62 = vadd.s32 %v1832_v28, %v386_v54  ;;  %v450_v3 = vmul.u32 2654435761, %v418_v55 }
  0xa6   : > { %v510_v6 = vxor.u32 %v478_v56, %v446_v52  ;;  %v512_v9 = vxor.u32 %v480_v57, %v448_v0  ;;  %v419_v14 = vadd.s32 %v1832_v28, %v385_v58  ;;  %v449_v15 = vmul.u32 2654435761, %v417_v59 }
  0xa7   : > { %1089 = vmatpush1.bf16.xpose.msk.msra.mxu0 %vm1088_vm11, %v1087_v31  ;;  %v509_v16 = vxor.u32 %v477_v60, %v445_v27  ;;  %v511_v20 = vxor.u32 %v479_v61, %v447_v53  ;;  %v452_v21 = vmul.u32 2654435761, %v420_v62  ;;  %v482_v22 = vshrl.u32 %v450_v3, 16 }
  0xa8   : > { %v542_v23 = vmul.u32 2246822507, %v510_v6  ;;  %v544_v24 = vmul.u32 2246822507, %v512_v9  ;;  %v481_v26 = vshrl.u32 %v449_v15, 16  ;;  %v326_v2 = vadd.s32 80, %v1800_v8 }
  0xa9   : > { %v541_v30 = vmul.u32 2246822507, %v509_v16  ;;  %v543_v32 = vmul.u32 2246822507, %v511_v20  ;;  %v484_v33 = vshrl.u32 %v452_v21, 16  ;;  %v514_v34 = vxor.u32 %v482_v22, %v450_v3  ;;  %v296_v20 = vld [vmem:[%s1761_s8 + $0x78] sm:$0xff] }
  0xaa   : > { %v574_v36 = vshrl.u32 %v542_v23, 13  ;;  %v576_v37 = vshrl.u32 %v544_v24, 13  ;;  %v451_v41 = vmul.u32 2654435761, %v419_v14  ;;  %v513_v42 = vxor.u32 %v481_v26, %v449_v15  ;;  %v294_v14 = vld [vmem:[%s1761_s8 + $0x68] sm:$0xff]  ;;  %v295_v22 = vld [vmem:[%s1761_s8 + $0x70] sm:$0xff] }
  0xab   : > { %v573_v18 = vshrl.u32 %v541_v30, 13  ;;  %v575_v19 = vshrl.u32 %v543_v32, 13  ;;  %v516_v31 = vxor.u32 %v484_v33, %v452_v21  ;;  %v546_v43 = vmul.u32 2246822507, %v514_v34  ;;  %v293_v21 = vld [vmem:[%s1761_s8 + $0x60] sm:$0xff]  ;;  %v1934_v33 = vld [vmem:[%s1761_s8 + $0x98] sm:$0xff] }
  0xac   : > { %v606_v44 = vxor.u32 %v574_v36, %v542_v23  ;;  %v608_v45 = vxor.u32 %v576_v37, %v544_v24  ;;  %v483_v46 = vshrl.u32 %v451_v41, 16  ;;  %v545_v35 = vmul.u32 2246822507, %v513_v42 }
  0xad   : > { %v605_v38 = vxor.u32 %v573_v18, %v541_v30  ;;  %v607_v47 = vxor.u32 %v575_v19, %v543_v32  ;;  %v548_v48 = vmul.u32 2246822507, %v516_v31  ;;  %v578_v4 = vshrl.u32 %v546_v43, 13  ;;  %v1931_v32 = vld [vmem:[%s1761_s8 + $0x88] sm:$0xff] }
  0xae   : > { %v638_v7 = vmul.u32 3266489909, %v606_v44  ;;  %v640_v11 = vmul.u32 3266489909, %v608_v45  ;;  %v515_v49 = vxor.u32 %v483_v46, %v451_v41  ;;  %v577_v50 = vshrl.u32 %v545_v35, 13  ;;  %v1960_v46 = vld [vmem:[%s1761_s8 + $0xa8] sm:$0xff] }
  0xaf   : > { %v637_v51 = vmul.u32 3266489909, %v605_v38  ;;  %v639_v63 = vmul.u32 3266489909, %v607_v47  ;;  %v580_v52 = vshrl.u32 %v548_v48, 13  ;;  %v610_v0 = vxor.u32 %v578_v4, %v546_v43  ;;  %v1952_v43 = vld [vmem:[%s1761_s8 + $0x90] sm:$0xff] }
  0xb0   : > { %v670_v27 = vshrl.u32 %v638_v7, 16  ;;  %v672_v53 = vshrl.u32 %v640_v11, 16  ;;  %v547_v54 = vmul.u32 2246822507, %v515_v49  ;;  %v609_v55 = vxor.u32 %v577_v50, %v545_v35  ;;  %v1963_v35 = vld [vmem:[%s1761_s8 + $0xb8] sm:$0xff] }
  0xb1   : > { %v669_v56 = vshrl.u32 %v637_v51, 16  ;;  %v671_v57 = vshrl.u32 %v639_v63, 16  ;;  %v612_v58 = vxor.u32 %v580_v52, %v548_v48  ;;  %v642_v59 = vmul.u32 3266489909, %v610_v0 }
  0xb2   : > { %v702_v60 = vxor.u32 %v670_v27, %v638_v7  ;;  %v704_v61 = vxor.u32 %v672_v53, %v640_v11  ;;  %v579_v62 = vshrl.u32 %v547_v54, 13  ;;  %v641_v3 = vmul.u32 3266489909, %v609_v55 }
  0xb3   : > { %v701_v6 = vxor.u32 %v669_v56, %v637_v51  ;;  %v703_v9 = vxor.u32 %v671_v57, %v639_v63  ;;  %v644_v15 = vmul.u32 3266489909, %v612_v58  ;;  %v674_v16 = vshrl.u32 %v642_v59, 16 }
  0xb4   : > { %vm734_vm12 = vcmp.lt.u32.totalorder %v702_v60, 2147483648  ;;  %vm736_vm13 = vcmp.lt.u32.totalorder %v704_v61, 2147483648  ;;  %v611_v23 = vxor.u32 %v579_v62, %v547_v54  ;;  %v673_v24 = vshrl.u32 %v641_v3, 16 }
  0xb5   : > { %vm1091_vm14 = vmpackc.low %vm736_vm13, %vm734_vm12  ;;  %vm733_vm15 = vcmp.lt.u32.totalorder %v701_v6, 2147483648  ;;  %vm735_vm0 = vcmp.lt.u32.totalorder %v703_v9, 2147483648  ;;  %v676_v26 = vshrl.u32 %v644_v15, 16  ;;  %v706_v30 = vxor.u32 %v674_v16, %v642_v59 }
  0xb6   : > { %1092 = vmatprep.subr.msk.bf16.mxu0 %vm1091_vm14, %v1090_v1  ;;  %vm1094_vm1 = vmpackc.low %vm735_vm0, %vm733_vm15  ;;  %v643_v34 = vmul.u32 3266489909, %v611_v23  ;;  %v705_v36 = vxor.u32 %v673_v24, %v641_v3  ;;  %v341_v37 = vadd.s32 %v1795_v5, %v1911_v13  ;;  %v342_v41 = vadd.s32 %v1795_v5, %v1924_v29  ;;  %v1949_v13 = vld [vmem:[%s1761_s8 + $0x80] sm:$0xff] }
  0xb7   : > { %1095 = vmatpush1.bf16.xpose.msk.msra.mxu0 %vm1094_vm1, %v1093_v12  ;;  %v708_v42 = vxor.u32 %v676_v26, %v644_v15  ;;  %vm738_vm2 = vcmp.lt.u32.totalorder %v706_v30, 2147483648  ;;  %v1096_v18 = vpack.c.bf16 %v296_v20, %v294_v14  ;;  %v1099_v39 = vpack.c.bf16 %v295_v22, %v293_v21 }
  0xb8   : > { %v675_v40 = vshrl.u32 %v643_v34, 16  ;;  %v363_v1 = vmul.u32 512, %v341_v37  ;;  %v364_v19 = vmul.u32 512, %v342_v41  ;;  %v1102_v31 = vpack.c.bf16 %v1934_v33, %v1931_v32 }
  0xb9   : > { %vm740_vm3 = vcmp.lt.u32.totalorder %v708_v42, 2147483648  ;;  %vm737_vm4 = vcmp.lt.u32.totalorder %v705_v36, 2147483648  ;;  %v327_v10 = vadd.s32 88, %v1800_v8  ;;  %v1105_v47 = vpack.c.bf16 %v1952_v43, %v1949_v13 }
  0xba   : > { %vm1097_vm5 = vmpackc.low %vm740_vm3, %vm738_vm2  ;;  %v707_v12 = vxor.u32 %v675_v40, %v643_v34  ;;  %v388_v29 = vadd.s32 %v363_v1, %v1828_v25  ;;  %v390_v44 = vadd.s32 %v364_v19, %v1828_v25  ;;  %v387_v45 = vadd.s32 %v363_v1, %v1815_v17 }
  0xbb   : > { %1098 = vmatprep.subr.msk.bf16.mxu0 %vm1097_vm5, %v1096_v18  ;;  %v389_v38 = vadd.s32 %v364_v19, %v1815_v17  ;;  %v343_v48 = vadd.s32 %v1795_v5, %v326_v2  ;;  %v344_v4 = vadd.s32 %v1795_v5, %v327_v10  ;;  %v1108_v52 = vpack.c.bf16 %v1963_v35, %v1960_v46 }
  0xbc   : > { %vm739_vm6 = vcmp.lt.u32.totalorder %v707_v12, 2147483648  ;;  %v422_v7 = vadd.s32 %v1832_v28, %v388_v29  ;;  %v424_v11 = vadd.s32 %v1832_v28, %v390_v44  ;;  %v421_v49 = vadd.s32 %v1832_v28, %v387_v45 }
  0xbd   : > { %vm1100_vm7 = vmpackc.low %vm739_vm6, %vm737_vm4  ;;  %v423_v50 = vadd.s32 %v1832_v28, %v389_v38  ;;  %v365_v51 = vmul.u32 512, %v343_v48  ;;  %v366_v63 = vmul.u32 512, %v344_v4  ;;  %v328_v53 = vadd.s32 96, %v1800_v8 }
  0xbe   : > { %v454_v0 = vmul.u32 2654435761, %v422_v7  ;;  %v456_v27 = vmul.u32 2654435761, %v424_v11  ;;  %v329_v54 = vadd.s32 104, %v1800_v8 }
  0xbf   : > { %1101 = vmatpush1.bf16.xpose.msk.msra.mxu0 %vm1100_vm7, %v1099_v39  ;;  %v453_v55 = vmul.u32 2654435761, %v421_v49  ;;  %v455_v56 = vmul.u32 2654435761, %v423_v50  ;;  %v392_v57 = vadd.s32 %v365_v51, %v1828_v25  ;;  %v394_v58 = vadd.s32 %v366_v63, %v1828_v25 }
  0xc0   : > { %v486_v59 = vshrl.u32 %v454_v0, 16  ;;  %v488_v60 = vshrl.u32 %v456_v27, 16  ;;  %v391_v61 = vadd.s32 %v365_v51, %v1815_v17  ;;  %v393_v62 = vadd.s32 %v366_v63, %v1815_v17 }
  0xc1   : > { %v485_v3 = vshrl.u32 %v453_v55, 16  ;;  %v487_v6 = vshrl.u32 %v455_v56, 16  ;;  %v426_v9 = vadd.s32 %v1832_v28, %v392_v57  ;;  %v428_v14 = vadd.s32 %v1832_v28, %v394_v58 }
  0xc2   : > { %v518_v15 = vxor.u32 %v486_v59, %v454_v0  ;;  %v520_v16 = vxor.u32 %v488_v60, %v456_v27  ;;  %v425_v20 = vadd.s32 %v1832_v28, %v391_v61  ;;  %v427_v21 = vadd.s32 %v1832_v28, %v393_v62 }
  0xc3   : > { %v517_v22 = vxor.u32 %v485_v3, %v453_v55  ;;  %v519_v23 = vxor.u32 %v487_v6, %v455_v56  ;;  %v458_v24 = vmul.u32 2654435761, %v426_v9  ;;  %v460_v26 = vmul.u32 2654435761, %v428_v14 }
  0xc4   : > { %v550_v30 = vmul.u32 2246822507, %v518_v15  ;;  %v552_v34 = vmul.u32 2246822507, %v520_v16  ;;  %v1988_v36 = vadd.s32 %v1795_v5, %v328_v53  ;;  %v1991_v37 = vadd.s32 %v1795_v5, %v329_v54 }
  0xc5   : > { %v549_v41 = vmul.u32 2246822507, %v517_v22  ;;  %v551_v42 = vmul.u32 2246822507, %v519_v23  ;;  %v490_v18 = vshrl.u32 %v458_v24, 16  ;;  %v492_v39 = vshrl.u32 %v460_v26, 16 }
  0xc6   : > { %v582_v40 = vshrl.u32 %v550_v30, 13  ;;  %v584_v1 = vshrl.u32 %v552_v34, 13  ;;  %v457_v19 = vmul.u32 2654435761, %v425_v20  ;;  %v459_v2 = vmul.u32 2654435761, %v427_v21 }
  0xc7   : > { %v581_v10 = vshrl.u32 %v549_v41, 13  ;;  %v583_v12 = vshrl.u32 %v551_v42, 13  ;;  %v522_v29 = vxor.u32 %v490_v18, %v458_v24  ;;  %v524_v44 = vxor.u32 %v492_v39, %v460_v26  ;;  %v301_v24 = vld [vmem:[%s1761_s8 + $0xa0] sm:$0xff]  ;;  %v303_v26 = vld [vmem:[%s1761_s8 + $0xb0] sm:$0xff] }
  0xc8   : > { %v614_v45 = vxor.u32 %v582_v40, %v550_v30  ;;  %v616_v38 = vxor.u32 %v584_v1, %v552_v34  ;;  %v489_v48 = vshrl.u32 %v457_v19, 16  ;;  %v491_v4 = vshrl.u32 %v459_v2, 16 }
  0xc9   : > { %v613_v7 = vxor.u32 %v581_v10, %v549_v41  ;;  %v615_v11 = vxor.u32 %v583_v12, %v551_v42  ;;  %v554_v49 = vmul.u32 2246822507, %v522_v29  ;;  %v556_v50 = vmul.u32 2246822507, %v524_v44 }
  0xca   : > { %v646_v51 = vmul.u32 3266489909, %v614_v45  ;;  %v648_v63 = vmul.u32 3266489909, %v616_v38  ;;  %v521_v0 = vxor.u32 %v489_v48, %v457_v19  ;;  %v523_v27 = vxor.u32 %v491_v4, %v459_v2  ;;  %v2017_v45 = vld [vmem:[%s1761_s8 + $0xd8] sm:$0xff] }
  0xcb   : > { %v645_v53 = vmul.u32 3266489909, %v613_v7  ;;  %v647_v54 = vmul.u32 3266489909, %v615_v11  ;;  %v586_v55 = vshrl.u32 %v554_v49, 13  ;;  %v588_v56 = vshrl.u32 %v556_v50, 13 }
  0xcc   : > { %v678_v57 = vshrl.u32 %v646_v51, 16  ;;  %v680_v58 = vshrl.u32 %v648_v63, 16  ;;  %v553_v59 = vmul.u32 2246822507, %v521_v0  ;;  %v555_v60 = vmul.u32 2246822507, %v523_v27 }
  0xcd   : > { %v677_v61 = vshrl.u32 %v645_v53, 16  ;;  %v679_v62 = vshrl.u32 %v647_v54, 16  ;;  %v618_v3 = vxor.u32 %v586_v55, %v554_v49  ;;  %v620_v6 = vxor.u32 %v588_v56, %v556_v50  ;;  %v2028_v50 = vld [vmem:[%s1761_s8 + $0xd0] sm:$0xff] }
  0xce   : > { %v710_v9 = vxor.u32 %v678_v57, %v646_v51  ;;  %v712_v14 = vxor.u32 %v680_v58, %v648_v63  ;;  %v585_v15 = vshrl.u32 %v553_v59, 13  ;;  %v587_v16 = vshrl.u32 %v555_v60, 13 }
  0xcf   : > { %v709_v20 = vxor.u32 %v677_v61, %v645_v53  ;;  %v711_v21 = vxor.u32 %v679_v62, %v647_v54  ;;  %v650_v22 = vmul.u32 3266489909, %v618_v3  ;;  %v652_v23 = vmul.u32 3266489909, %v620_v6 }
  0xd0   : > { %vm742_vm8 = vcmp.lt.u32.totalorder %v710_v9, 2147483648  ;;  %vm744_vm9 = vcmp.lt.u32.totalorder %v712_v14, 2147483648  ;;  %v617_v30 = vxor.u32 %v585_v15, %v553_v59  ;;  %v619_v34 = vxor.u32 %v587_v16, %v555_v60 }
  0xd1   : > { %vm1103_vm10 = vmpackc.low %vm744_vm9, %vm742_vm8  ;;  %vm741_vm11 = vcmp.lt.u32.totalorder %v709_v20, 2147483648  ;;  %vm743_vm12 = vcmp.lt.u32.totalorder %v711_v21, 2147483648  ;;  %v682_v41 = vshrl.u32 %v650_v22, 16  ;;  %v684_v42 = vshrl.u32 %v652_v23, 16 }
  0xd2   : > { %1104 = vmatprep.subr.msk.bf16.mxu0 %vm1103_vm10, %v1102_v31  ;;  %vm1106_vm13 = vmpackc.low %vm743_vm12, %vm741_vm11  ;;  %v649_v18 = vmul.u32 3266489909, %v617_v30  ;;  %v651_v39 = vmul.u32 3266489909, %v619_v34  ;;  %v1111_v40 = vpack.c.bf16 %v303_v26, %v301_v24  ;;  %v330_v1 = vadd.s32 112, %v1800_v8 }
  0xd3   : > { %1107 = vmatpush1.bf16.xpose.msk.msra.mxu0 %vm1106_vm13, %v1105_v47  ;;  %v714_v19 = vxor.u32 %v682_v41, %v650_v22  ;;  %v716_v2 = vxor.u32 %v684_v42, %v652_v23  ;;  %v367_v10 = vmul.u32 512, %v1988_v36  ;;  %v368_v12 = vmul.u32 512, %v1991_v37 }
  0xd4   : > { %v681_v32 = vshrl.u32 %v649_v18, 16  ;;  %v683_v33 = vshrl.u32 %v651_v39, 16  ;;  %v331_v31 = vadd.s32 120, %v1800_v8  ;;  %v347_v29 = vadd.s32 %v1795_v5, %v330_v1  ;;  %v2014_v8 = vld [vmem:[%s1761_s8 + $0xc8] sm:$0xff] }
  0xd5   : > { %vm746_vm14 = vcmp.lt.u32.totalorder %v714_v19, 2147483648  ;;  %vm748_vm15 = vcmp.lt.u32.totalorder %v716_v2, 2147483648  ;;  %v396_v44 = vadd.s32 %v367_v10, %v1828_v25  ;;  %v398_v13 = vadd.s32 %v368_v12, %v1828_v25 }
  0xd6   : > { %vm1109_vm0 = vmpackc.low %vm748_vm15, %vm746_vm14  ;;  %v713_v43 = vxor.u32 %v681_v32, %v649_v18  ;;  %v715_v47 = vxor.u32 %v683_v33, %v651_v39  ;;  %v395_v36 = vadd.s32 %v367_v10, %v1815_v17  ;;  %v397_v37 = vadd.s32 %v368_v12, %v1815_v17 }
  0xd7   : > { %1110 = vmatprep.subr.msk.bf16.mxu0 %vm1109_vm0, %v1108_v52  ;;  %v430_v38 = vadd.s32 %v1832_v28, %v396_v44  ;;  %v432_v48 = vadd.s32 %v1832_v28, %v398_v13  ;;  %v348_v4 = vadd.s32 %v1795_v5, %v331_v31  ;;  %v369_v7 = vmul.u32 512, %v347_v29  ;;  %v2025_v52 = vld [vmem:[%s1761_s8 + $0xc0] sm:$0xff] }
  0xd8   : > { %vm745_vm1 = vcmp.lt.u32.totalorder %v713_v43, 2147483648  ;;  %vm747_vm2 = vcmp.lt.u32.totalorder %v715_v47, 2147483648  ;;  %v429_v11 = vadd.s32 %v1832_v28, %v395_v36  ;;  %v431_v49 = vadd.s32 %v1832_v28, %v397_v37 }
  0xd9   : > { %vm1112_vm3 = vmpackc.low %vm747_vm2, %vm745_vm1  ;;  %v462_v46 = vmul.u32 2654435761, %v430_v38  ;;  %v464_v35 = vmul.u32 2654435761, %v432_v48  ;;  %v400_v51 = vadd.s32 %v369_v7, %v1828_v25  ;;  %v1114_v63 = vpack.c.bf16 %v2017_v45, %v2014_v8 }
  0xda   : > { %v461_v5 = vmul.u32 2654435761, %v429_v11  ;;  %v463_v0 = vmul.u32 2654435761, %v431_v49  ;;  %v399_v27 = vadd.s32 %v369_v7, %v1815_v17  ;;  %v1117_v59 = vpack.c.bf16 %v2028_v50, %v2025_v52  ;;  %v790_v52 = vld [vmem:[%s230_s7] sm:$0xff]  ;;  %v789_v50 = vld [vmem:[#allocation2] sm:$0xff] }
  0xdb   : > { %1113 = vmatpush1.bf16.xpose.msk.msra.mxu0 %vm1112_vm3, %v1111_v40  ;;  %v494_v53 = vshrl.u32 %v462_v46, 16  ;;  %v496_v54 = vshrl.u32 %v464_v35, 16  ;;  %v370_v55 = vmul.u32 512, %v348_v4  ;;  %v434_v56 = vadd.s32 %v1832_v28, %v400_v51 }
  0xdc   : > { %v493_v57 = vshrl.u32 %v461_v5, 16  ;;  %v495_v58 = vshrl.u32 %v463_v0, 16  ;;  %v433_v60 = vadd.s32 %v1832_v28, %v399_v27 }
  0xdd   : > { %v526_v61 = vxor.u32 %v494_v53, %v462_v46  ;;  %v528_v62 = vxor.u32 %v496_v54, %v464_v35  ;;  %v402_v3 = vadd.s32 %v370_v55, %v1828_v25  ;;  %v466_v6 = vmul.u32 2654435761, %v434_v56 }
  0xde   : > { %v525_v9 = vxor.u32 %v493_v57, %v461_v5  ;;  %v527_v14 = vxor.u32 %v495_v58, %v463_v0  ;;  %v401_v15 = vadd.s32 %v370_v55, %v1815_v17  ;;  %v465_v16 = vmul.u32 2654435761, %v433_v60 }
  0xdf   : > { %v558_v20 = vmul.u32 2246822507, %v526_v61  ;;  %v560_v21 = vmul.u32 2246822507, %v528_v62  ;;  %v436_v22 = vadd.s32 %v1832_v28, %v402_v3  ;;  %v498_v23 = vshrl.u32 %v466_v6, 16 }
  0xe0   : > { %v557_v24 = vmul.u32 2246822507, %v525_v9  ;;  %v559_v26 = vmul.u32 2246822507, %v527_v14  ;;  %v435_v30 = vadd.s32 %v1832_v28, %v401_v15  ;;  %v497_v34 = vshrl.u32 %v465_v16, 16  ;;  %v310_v9 = vld [vmem:[%s1761_s8 + $0xe8] sm:$0xff] }
  0xe1   : > { %v590_v41 = vshrl.u32 %v558_v20, 13  ;;  %v592_v42 = vshrl.u32 %v560_v21, 13  ;;  %v468_v18 = vmul.u32 2654435761, %v436_v22  ;;  %v530_v25 = vxor.u32 %v498_v23, %v466_v6  ;;  %v312_v14 = vld [vmem:[%s1761_s8 + $0xf8] sm:$0xff]  ;;  %v311_v22 = vld [vmem:[%s1761_s8 + $0xf0] sm:$0xff] }
  0xe2   : > { %v589_v39 = vshrl.u32 %v557_v24, 13  ;;  %v591_v40 = vshrl.u32 %v559_v26, 13  ;;  %v467_v1 = vmul.u32 2654435761, %v435_v30  ;;  %v529_v19 = vxor.u32 %v497_v34, %v465_v16 }
  0xe3   : > { %v622_v17 = vxor.u32 %v590_v41, %v558_v20  ;;  %v624_v2 = vxor.u32 %v592_v42, %v560_v21  ;;  %v500_v10 = vshrl.u32 %v468_v18, 16  ;;  %v562_v12 = vmul.u32 2246822507, %v530_v25  ;;  %v309_v21 = vld [vmem:[%s1761_s8 + $0xe0] sm:$0xff]  ;;  %v1071_v41 = vld [vmem:[%s275_s28] ss:$0 sm:$0xff] (!%p1070_p13) }
  0xe4   : > { %v621_v32 = vxor.u32 %v589_v39, %v557_v24  ;;  %v623_v33 = vxor.u32 %v591_v40, %v559_v26  ;;  %v499_v31 = vshrl.u32 %v467_v1, 16  ;;  %v561_v29 = vmul.u32 2246822507, %v529_v19 }
  0xe5   : > { %v654_v44 = vmul.u32 3266489909, %v622_v17  ;;  %v656_v13 = vmul.u32 3266489909, %v624_v2  ;;  %v532_v28 = vxor.u32 %v500_v10, %v468_v18  ;;  %v594_v43 = vshrl.u32 %v562_v12, 13 }
  0xe6   : > { %v653_v47 = vmul.u32 3266489909, %v621_v32  ;;  %v655_v36 = vmul.u32 3266489909, %v623_v33  ;;  %v531_v37 = vxor.u32 %v499_v31, %v467_v1  ;;  %v593_v38 = vshrl.u32 %v561_v29, 13 }
  0xe7   : > { %v686_v48 = vshrl.u32 %v654_v44, 16  ;;  %v688_v4 = vshrl.u32 %v656_v13, 16  ;;  %v564_v7 = vmul.u32 2246822507, %v532_v28  ;;  %v626_v11 = vxor.u32 %v594_v43, %v562_v12 }
  0xe8   : > { %v685_v49 = vshrl.u32 %v653_v47, 16  ;;  %v687_v46 = vshrl.u32 %v655_v36, 16  ;;  %v563_v35 = vmul.u32 2246822507, %v531_v37  ;;  %v625_v51 = vxor.u32 %v593_v38, %v561_v29 }
  0xe9   : > { %v718_v5 = vxor.u32 %v686_v48, %v654_v44  ;;  %v720_v0 = vxor.u32 %v688_v4, %v656_v13  ;;  %v596_v27 = vshrl.u32 %v564_v7, 13  ;;  %v658_v53 = vmul.u32 3266489909, %v626_v11 }
  0xea   : > { %v717_v54 = vxor.u32 %v685_v49, %v653_v47  ;;  %v719_v55 = vxor.u32 %v687_v46, %v655_v36  ;;  %v595_v56 = vshrl.u32 %v563_v35, 13  ;;  %v657_v57 = vmul.u32 3266489909, %v625_v51 }
  0xeb   : > { %vm750_vm4 = vcmp.lt.u32.totalorder %v718_v5, 2147483648  ;;  %vm752_vm5 = vcmp.lt.u32.totalorder %v720_v0, 2147483648  ;;  %v628_v58 = vxor.u32 %v596_v27, %v564_v7  ;;  %v690_v60 = vshrl.u32 %v658_v53, 16 }
  0xec   : > { %vm1115_vm6 = vmpackc.low %vm752_vm5, %vm750_vm4  ;;  %vm749_vm7 = vcmp.lt.u32.totalorder %v717_v54, 2147483648  ;;  %vm751_vm8 = vcmp.lt.u32.totalorder %v719_v55, 2147483648  ;;  %v627_v61 = vxor.u32 %v595_v56, %v563_v35  ;;  %v689_v62 = vshrl.u32 %v657_v57, 16 }
  0xed   : > { %1116 = vmatprep.subr.msk.bf16.mxu0 %vm1115_vm6, %v1114_v63  ;;  %vm1118_vm9 = vmpackc.low %vm751_vm8, %vm749_vm7  ;;  %v660_v3 = vmul.u32 3266489909, %v628_v58  ;;  %v722_v6 = vxor.u32 %v690_v60, %v658_v53  ;;  %v1120_v8 = vpack.c.bf16 %v312_v14, %v310_v9  ;;  %v1123_v63 = vpack.c.bf16 %v311_v22, %v309_v21 }
  0xee   : > { %1119 = vmatpush1.bf16.xpose.msk.msra.mxu0 %vm1118_vm9, %v1117_v59  ;;  %v659_v15 = vmul.u32 3266489909, %v627_v61  ;;  %v721_v16 = vxor.u32 %v689_v62, %v657_v57 }
  0xef   : > { %v692_v20 = vshrl.u32 %v660_v3, 16  ;;  %vm754_vm10 = vcmp.lt.u32.totalorder %v722_v6, 2147483648 }
  0xf0   : > { %v691_v23 = vshrl.u32 %v659_v15, 16  ;;  %vm753_vm11 = vcmp.lt.u32.totalorder %v721_v16, 2147483648 }
  0xf1   : > { %v724_v24 = vxor.u32 %v692_v20, %v660_v3 }
  0xf2   : > { %v723_v45 = vxor.u32 %v691_v23, %v659_v15 }
  0xf3   : > { %vm756_vm12 = vcmp.lt.u32.totalorder %v724_v24, 2147483648 }
  0xf4   : > { %vm1121_vm13 = vmpackc.low %vm756_vm12, %vm754_vm10  ;;  %vm755_vm14 = vcmp.lt.u32.totalorder %v723_v45, 2147483648 }
  0xf5   : > { %1122 = vmatprep.subr.msk.bf16.mxu0 %vm1121_vm13, %v1120_v8  ;;  %vm1124_vm15 = vmpackc.low %vm755_vm14, %vm753_vm11 }
  0xf6   : > { %1125 = vmatpush1.bf16.xpose.msk.msra.mxu0 %vm1124_vm15, %v1123_v63 }
  0xfd   : > { %857 = vmatmul.mubr.f32.vlgmr.msra.gmra.mrb[0].mxu0 %v790_v52 }
 0x1cd   : > { %867 = sbr.rel (%p1070_p13) target bundleno = 480 (0x1e0), region = 48 }
 0x1d0   : > { %v858_v59 = vpop.f32.mrb[0].mxu0 }
 0x1d1   : > { %v862_v26 = vadd.f32 %v858_v59, %v789_v50  ;;  %v860_v30 = vpop.f32.mrb[1].mxu0 }
 0x1d3   : > { %863 = vst [vmem:[#allocation2] sm:$0xff] %v862_v26 }
 0x1da   : > { %v868_v34 = vld [vmem:[#allocation2] sm:$0xff] }
 0x1db   : > { %v869_v42 = vmul.f32 2.0, %v868_v34 }
 0x1dd   : > { %v877_v18 = vadd.f32 %v1071_v41, %v869_v42 }
 0x1df   : > { %878 = vst [vmem:[%s269_s1] sm:$0xff] %v877_v18 }
 0x1e0 PF: > { %s2067_s25 = scalar_lea.hbm %s2146_s4, %s1036_s5  ;;  %s895_s19 = sshll.u32 %s269_s1, 4  ;;  %s896_s19 = int_to_ptr.vmem [resolvable:$true] %s895_s19 }
 0x1e1   : > { %s880_s30 = scalar_lea.sflag [#allocation7], %s267_s12  ;;  %s1321_s8 = scalar_lea.vmem %s896_s19, 128 }
 0x1e2   : > { %p1322_p2 = scmp.ne.s32.totalorder %s896_s19, %s1321_s8  ;;  %p2180_p12 = scmp.ne.s32.totalorder %s2170_s14, 0 }
 0x1e3   : > { %s1479_s16 = smov [#allocation10]  }
 0x1e4   : > { %p1323_p6 = pnand %p1322_p2, %p2180_p12  ;;  %s1325_s26 = sshll.u32 %s1479_s16, 4  ;;  %s1326_s26 = int_to_ptr.vmem [resolvable:$false] %s1325_s26 }
 0x1e5   : > { %s1327_s24 = scalar_lea.vmem %s1326_s26, 256  ;;  %p1328_p8 = scmp.lt.s32.totalorder %s896_s19, %s1326_s26 }
 0x1e6   : > { %p1324_p9 = pneg %p1323_p6  ;;  %p1329_p10 = scmp.lt.s32.totalorder %s1327_s24, %s1321_s8 }
 0x1e8   : > { %p1330_p7 = por %p1329_p10, %p1328_p8 }
 0x1ea   : > { %p1331_p1 = pnand %p1330_p7, %p1324_p9 }
 0x1ec   : > { %1334 = shalt.err (!%p1331_p1)
}
 0x1ed   : > { %s1335_s12 = scalar_lea.hbm %s2067_s25, 128  ;;  %s1339_s28 = scalar_lea.hbm %s2146_s4, 384 }
 0x1ee   : > { %p1336_p3 = scmp.ne.s32.totalorder %s2067_s25, %s1335_s12  ;;  %p1340_p4 = scmp.lt.u32.totalorder %s2067_s25, %s2146_s4 }
 0x1ef   : > { %p1341_p5 = scmp.lt.u32.totalorder %s1339_s28, %s1335_s12  ;;  %p1343_p2 = scmp.lt.u32.totalorder %s1335_s12, %s2067_s25 }
 0x1f0   : > { %p1337_p0 = pnand %p1336_p3, %p2180_p12 }
 0x1f1   : > { %p1342_p13 = por %p1341_p5, %p1340_p4 }
 0x1f2   : > { %p1338_p11 = pneg %p1337_p0 }
 0x1f3   : > { %p1344_p6 = por %p1343_p2, %p1342_p13 }
 0x1f5   : > { %p1345_p9 = pnand %p1344_p6, %p1338_p11 }
 0x1f7   : > { %1348 = shalt.err (!%p1345_p9)
}
 0x1f8   : > { %1130 = dma.vmem_to_hbm [thread:$0]  (%p2180_p12), %s896_s19, 128, %s2067_s25, %s880_s30  }
 0x1f9 PF: > { %p1144_p8 = scmp.ge.s32.totalorder %s1471_s29, 2  ;;  %s907_s20 = sand.u32 1, %s1419_s17  }
 0x1fa   : > { %p2181_p10 = scmp.ne.s32.totalorder %s2171_s11, 0  ;;  %s908_s15 = scalar_lea.sflag [#allocation7], %s907_s20 }
 0x1fc   : > { %p1140_p7 = pnand %p1144_p8, %p2181_p10 }
 0x1fe   : > { %1414 = dma.done.wait (!%p1140_p7), %s908_s15, 128  }
 0x1ff   : > { %1416 = vsyncadd (!%p1140_p7), %s908_s15, 4294967168  ;;  %s24_s29 = sadd.s32 1, %s1471_s29   ;;  %s2183_s14 = sld [smem:[#allocation14_spill]] }
 0x200   : > { %p2095_p1 = scmp.ge.s32.totalorder %s24_s29, 8   ;;  %s2184_s19 = sld [smem:[#allocation21_spill]] }
 0x201   : > { %s2185_s6 = sld [smem:[#allocation20_spill]]  ;;  %s2186_s10 = sld [smem:[#allocation15_spill]] }
 0x202   : > { %s2187_s24 = sld [smem:[#allocation19_spill]]  ;;  %s2188_s26 = sld [smem:[#allocation16_spill]] }
 0x203   : > { %s2189_s11 = sld [smem:[#allocation17_spill]]  ;;  %s2190_s28 = sld [smem:[#allocation18_spill]] }
 0x204   : > { %s2191_s17 = smov %s1423_s18  ;;  %s2193_s20 = smov %s1435_s21 }
 0x205   : > { %s2192_s18 = smov %s2183_s14  ;;  %s2194_s21 = smov %s1439_s22 }
 0x206   : > { %s2196_s23 = smov %s1447_s0  ;;  %s2198_s25 = smov %s1463_s27 }
 0x207   : > { %s2195_s22 = smov %s2185_s6  ;;  %s2197_s0 = smov %s2186_s10 }
 0x208   :  { %23 = sbr.rel (!%p2095_p1) target bundleno = 15 (0xf), region = 101 }
 0x209   : > { %s2199_s27 = smov %s2189_s11 }
 0x20f   :  { %913 = vsyncpa [#allocation6], 1 }
 0x210   :  { %915 = vsyncpa [#allocation6 + $0x1], 1 }
 0x211   :  { %916 = vsyncpa [#allocation9], 1 }
 0x212   :  { %918 = vsyncpa [#allocation9 + $0x1], 1 }
 0x213   :  { %919 = vsyncpa [#allocation7], 1 }
 0x214   :  { %921 = vsyncpa [#allocation7 + $0x1], 1 }

</bundles_post_ra>
